<compile_context>
chip_gen: v5e
topology: v5e:2x2
jax: 0.10.0
libtpu: 0.0.40
codegen_flags: <defaults>
</compile_context>

<pallas_src>
import functools

import jax
import jax.numpy as jnp
from jax.experimental import pallas as pl
from jax.experimental.pallas import tpu as pltpu

LANE = 128                 # vreg lane width
MAX_BLOCK_ROWS = 8192      # 8192 x 128 x 4B = 4 MiB per f32 input tile
MIN_SPLIT_ROWS = 1024      # below 2x this, keep a single tile on a single core


def _round_up(a, b):
    return (a + b - 1) // b * b


def _mse_partial_kernel(x_ref, y_ref, o_ref, acc_ref, *,
                        rows, block_rows, steps_per_core):
    """Per-core partial sum of (x - y)^2 over this core's row range."""
    c = pl.program_id(0)             # core / parallel index
    k = pl.program_id(1)             # reduction step within this core

    @pl.when(k == 0)
    def _init():
        acc_ref[...] = jnp.zeros_like(acc_ref)

    d = x_ref[...].astype(jnp.float32) - y_ref[...].astype(jnp.float32)

    # Intended (unclamped) tile -> global row base; used for tail masking.
    row_base = (c * steps_per_core + k) * block_rows
    is_full = row_base + block_rows <= rows

    @pl.when(is_full)                      # hot path: pure VPU accumulate
    def _full():
        acc_ref[...] += d * d

    @pl.when(jnp.logical_not(is_full))     # cold path: ragged / clamped tile
    def _masked():
        rid = row_base + jax.lax.broadcasted_iota(jnp.int32, d.shape, 0)
        dm = jnp.where(rid < rows, d, 0.0)
        acc_ref[...] += dm * dm

    @pl.when(k == pl.num_programs(1) - 1)
    def _finalize():
        # Single cross-lane reduce, once per core.
        o_ref[...] = jnp.broadcast_to(jnp.sum(acc_ref[...]), (1, 1))


def mse_loss(x, y):
    assert x.shape == y.shape, "MSELoss expects matching shapes"
    n = x.size
    if n == 0:
        return jnp.float32(jnp.nan)        # torch.mean of an empty tensor is NaN

    xf = x.reshape(-1)
    yf = y.reshape(-1)

    if n % LANE != 0:
        # TODO(synk): rare ragged-numel case keeps a small pad-to-128 copy; the
        # common (numel % 128 == 0) path below is copy-free.
        pad = (-n) % LANE
        xf = jnp.concatenate([xf, jnp.zeros((pad,), xf.dtype)])
        yf = jnp.concatenate([yf, jnp.zeros((pad,), yf.dtype)])

    rows = xf.size // LANE
    x2 = xf.reshape(rows, LANE)
    y2 = yf.reshape(rows, LANE)

    # Tile selection: big tiles (<= 4 MiB each), an even tile count so the
    # 2-way core split never duplicates a tile read, ragged last tile masked.
    if rows < 2 * MIN_SPLIT_ROWS:
        block_rows, num_tiles, num_cores = rows, 1, 1
    else:
        num_tiles = _round_up(max(2, pl.cdiv(rows, MAX_BLOCK_ROWS)), 2)
        block_rows = _round_up(pl.cdiv(rows, num_tiles), 8)
        num_cores = 2
    steps_per_core = num_tiles // num_cores
    last_valid_tile = (rows - 1) // block_rows   # clamp => DMA always in-bounds

    def in_map(c, k):
        t = jnp.minimum(c * steps_per_core + k, last_valid_tile)
        return (t, 0)

    kernel = functools.partial(
        _mse_partial_kernel,
        rows=rows, block_rows=block_rows, steps_per_core=steps_per_core)

    itemsize = jnp.dtype(x.dtype).itemsize

    partials = pl.pallas_call(
        kernel,
        out_shape=jax.ShapeDtypeStruct((num_cores, 1), jnp.float32),
        grid_spec=pltpu.PrefetchScalarGridSpec(
            num_scalar_prefetch=0,
            grid=(num_cores, steps_per_core),
            in_specs=[
                pl.BlockSpec((block_rows, LANE), in_map),
                pl.BlockSpec((block_rows, LANE), in_map),
            ],
            out_specs=pl.BlockSpec((1, 1), lambda c, k: (c, 0)),
            scratch_shapes=[pltpu.VMEM((block_rows, LANE), jnp.float32)],
        ),
        compiler_params=pltpu.CompilerParams(
            dimension_semantics=("parallel", "arbitrary"),
            vmem_limit_bytes=32 * 1024 * 1024,
        ),
        cost_estimate=pl.CostEstimate(
            flops=3 * n,
            transcendentals=0,
            bytes_accessed=2 * n * itemsize + 4 * num_cores),
    )(x2, y2)

    # Combine per-core partial sums; mean over the TRUE element count.
    return jnp.sum(partials) * jnp.float32(1.0 / n)


if __name__ == "__main__":
    key = jax.random.PRNGKey(0)
    kx, ky = jax.random.split(key)
    x = jax.random.normal(kx, (2, 4, 16, 16), dtype=jnp.float32)  # NCHW
    y = jax.random.normal(ky, (2, 4, 16, 16), dtype=jnp.float32)

    loss = mse_loss(x, y)
    jax.block_until_ready(loss)

    ref = jnp.mean((x - y) ** 2)
    assert jnp.allclose(loss, ref, rtol=1e-6, atol=1e-6), (loss, ref)

    print("KERNEL_OK")
</pallas_src>

<mosaic_0001>
module attributes {stable_mosaic.version = 11 : i64} {
  func.func @_mse_partial_kernel(%arg0: i32, %arg1: i32, %arg2: memref<16x128xf32, #tpu.memory_space<vmem>>, %arg3: memref<16x128xf32, #tpu.memory_space<vmem>>, %arg4: memref<1x1xf32, #tpu.memory_space<vmem>>, %arg5: memref<16x128xf32, #tpu.memory_space<vmem>>) attributes {dimension_semantics = [#tpu.dimension_semantics<parallel>, #tpu.dimension_semantics<arbitrary>], iteration_bounds = array<i64: 1, 1>, scalar_prefetch = 0 : i64, scratch_operands = 1 : i64, tpu.core_type = #tpu.core_type<tc>, window_params = [{transform_indices = @transform_0, window_bounds = array<i64: 16, 128>}, {transform_indices = @transform_1, window_bounds = array<i64: 16, 128>}, {transform_indices = @transform_2, window_bounds = array<i64: 1, 1>}]} {
    %c0_i32 = arith.constant 0 : i32
    %0 = arith.cmpi eq, %arg1, %c0_i32 : i32
    %1 = arith.extui %0 : i1 to i32
    %c0_i32_0 = arith.constant 0 : i32
    %2 = arith.cmpi ne, %1, %c0_i32_0 : i32
    scf.if %2 {
      %cst = arith.constant 0.000000e+00 : f32
      %19 = vector.broadcast %cst : f32 to vector<16x128xf32>
      %c0_10 = arith.constant 0 : index
      %c0_11 = arith.constant 0 : index
      %20 = vector.load %arg5[%c0_10, %c0_11] : memref<16x128xf32, #tpu.memory_space<vmem>>, vector<16x128xf32>
      tpu.vector_store %arg5[%c0_10, %c0_11], %19 {strides = array<i32>} : memref<16x128xf32, #tpu.memory_space<vmem>>, vector<16x128xf32>,
    } else {
    }
    %c0 = arith.constant 0 : index
    %c0_1 = arith.constant 0 : index
    %3 = vector.load %arg2[%c0, %c0_1] : memref<16x128xf32, #tpu.memory_space<vmem>>, vector<16x128xf32>
    %c0_2 = arith.constant 0 : index
    %c0_3 = arith.constant 0 : index
    %4 = vector.load %arg3[%c0_2, %c0_3] : memref<16x128xf32, #tpu.memory_space<vmem>>, vector<16x128xf32>
    %5 = arith.subf %3, %4 : vector<16x128xf32>
    %c1_i32 = arith.constant 1 : i32
    %6 = arith.muli %arg0, %c1_i32 : i32
    %7 = arith.addi %6, %arg1 : i32
    %c16_i32 = arith.constant 16 : i32
    %8 = arith.muli %7, %c16_i32 : i32
    %c16_i32_4 = arith.constant 16 : i32
    %9 = arith.addi %8, %c16_i32_4 : i32
    %c16_i32_5 = arith.constant 16 : i32
    %10 = arith.cmpi sle, %9, %c16_i32_5 : i32
    %11 = arith.extui %10 : i1 to i32
    %c0_i32_6 = arith.constant 0 : i32
    %12 = arith.cmpi ne, %11, %c0_i32_6 : i32
    scf.if %12 {
      %c0_10 = arith.constant 0 : index
      %c0_11 = arith.constant 0 : index
      %19 = vector.load %arg5[%c0_10, %c0_11] : memref<16x128xf32, #tpu.memory_space<vmem>>, vector<16x128xf32>
      %20 = arith.mulf %5, %5 : vector<16x128xf32>
      %21 = arith.addf %19, %20 : vector<16x128xf32>
      %c0_12 = arith.constant 0 : index
      %c0_13 = arith.constant 0 : index
      %22 = vector.load %arg5[%c0_12, %c0_13] : memref<16x128xf32, #tpu.memory_space<vmem>>, vector<16x128xf32>
      tpu.vector_store %arg5[%c0_12, %c0_13], %21 {strides = array<i32>} : memref<16x128xf32, #tpu.memory_space<vmem>>, vector<16x128xf32>,
    } else {
    }
    %true = arith.constant true
    %13 = arith.xori %10, %true : i1
    %14 = arith.extui %13 : i1 to i32
    %c0_i32_7 = arith.constant 0 : i32
    %15 = arith.cmpi ne, %14, %c0_i32_7 : i32
    scf.if %15 {
      %19 = tpu.iota {dimensions = array<i32: 0>} : vector<16x128xi32>
      %20 = vector.broadcast %8 : i32 to vector<16x128xi32>
      %21 = arith.addi %20, %19 : vector<16x128xi32>
      %c16_i32_10 = arith.constant 16 : i32
      %22 = vector.broadcast %c16_i32_10 : i32 to vector<16x128xi32>
      %23 = arith.cmpi slt, %21, %22 : vector<16x128xi32>
      %cst = arith.constant 0.000000e+00 : f32
      %24 = vector.broadcast %cst : f32 to vector<16x128xf32>
      %25 = arith.select %23, %5, %24 : vector<16x128xi1>, vector<16x128xf32>
      %c0_11 = arith.constant 0 : index
      %c0_12 = arith.constant 0 : index
      %26 = vector.load %arg5[%c0_11, %c0_12] : memref<16x128xf32, #tpu.memory_space<vmem>>, vector<16x128xf32>
      %27 = arith.mulf %25, %25 : vector<16x128xf32>
      %28 = arith.addf %26, %27 : vector<16x128xf32>
      %c0_13 = arith.constant 0 : index
      %c0_14 = arith.constant 0 : index
      %29 = vector.load %arg5[%c0_13, %c0_14] : memref<16x128xf32, #tpu.memory_space<vmem>>, vector<16x128xf32>
      tpu.vector_store %arg5[%c0_13, %c0_14], %28 {strides = array<i32>} : memref<16x128xf32, #tpu.memory_space<vmem>>, vector<16x128xf32>,
    } else {
    }
    %c0_i32_8 = arith.constant 0 : i32
    %16 = arith.cmpi eq, %arg1, %c0_i32_8 : i32
    %17 = arith.extui %16 : i1 to i32
    %c0_i32_9 = arith.constant 0 : i32
    %18 = arith.cmpi ne, %17, %c0_i32_9 : i32
    scf.if %18 {
      %c0_10 = arith.constant 0 : index
      %c0_11 = arith.constant 0 : index
      %19 = vector.load %arg5[%c0_10, %c0_11] : memref<16x128xf32, #tpu.memory_space<vmem>>, vector<16x128xf32>
      %20 = vector.shape_cast %19 : vector<16x128xf32> to vector<1x16x128xf32>
      %cst = arith.constant dense<0.000000e+00> : vector<1xf32>
      %21 = vector.multi_reduction <add>, %20, %cst [1, 2] : vector<1x16x128xf32> to vector<1xf32>
      %22 = vector.shape_cast %21 : vector<1xf32> to vector<1x1x1xf32>
      %23 = vector.extract %22[0, 0, 0] : f32 from vector<1x1x1xf32>
      %24 = vector.broadcast %23 : f32 to vector<1x1xf32>
      %c0_12 = arith.constant 0 : index
      %c0_13 = arith.constant 0 : index
      %25 = vector.load %arg4[%c0_12, %c0_13] : memref<1x1xf32, #tpu.memory_space<vmem>>, vector<1x1xf32>
      tpu.vector_store %arg4[%c0_12, %c0_13], %24 {strides = array<i32>} : memref<1x1xf32, #tpu.memory_space<vmem>>, vector<1x1xf32>,
    } else {
    }
    return
  }
  func.func @transform_0(%arg0: i32, %arg1: i32) -> (i32, i32) {
    %c1_i32 = arith.constant 1 : i32
    %0 = arith.muli %arg0, %c1_i32 : i32
    %1 = arith.addi %0, %arg1 : i32
    %c0_i32 = arith.constant 0 : i32
    %2 = arith.minsi %1, %c0_i32 : i32
    %c0_i32_0 = arith.constant 0 : i32
    %c0_i32_1 = arith.constant 0 : i32
    return %2, %c0_i32_0 : i32, i32
  }
  func.func @transform_1(%arg0: i32, %arg1: i32) -> (i32, i32) {
    %c1_i32 = arith.constant 1 : i32
    %0 = arith.muli %arg0, %c1_i32 : i32
    %1 = arith.addi %0, %arg1 : i32
    %c0_i32 = arith.constant 0 : i32
    %2 = arith.minsi %1, %c0_i32 : i32
    %c0_i32_0 = arith.constant 0 : i32
    %c0_i32_1 = arith.constant 0 : i32
    return %2, %c0_i32_0 : i32, i32
  }
  func.func @transform_2(%arg0: i32, %arg1: i32) -> (i32, i32) {
    %c0_i32 = arith.constant 0 : i32
    %c0_i32_0 = arith.constant 0 : i32
    return %arg0, %c0_i32 : i32, i32
  }
}

</mosaic_0001>

<bundles_post_ra>
// kernel: tpu_custom_call.1
= control target key start
LH: loop header
LB: loop body
LE: loop exit
PB: predicated region body
PF: predicated region fallthrough
CT: control target
= control target key end

     0   :  { %7 = vsyncpa [#allocation4], 0  ;;  %s267_s0 = inlined_call_operand.hbm [shape: f32[16,128], index: 0, kind: input, shape index: {}]   ;;  %s268_s1 = inlined_call_operand.hbm [shape: f32[16,128], index: 1, kind: input, shape index: {}]   ;;  %s269_s2 = inlined_call_operand.hbm [shape: f32[1,1], index: 2, kind: output, shape index: {}]  }
   0x1   :  { %8 = vsyncpa [#allocation7], 0 }
   0x2   :  { %9 = vsyncpa [#allocation5], 0  ;;  %s20_s11 = sshll.u32 %s267_s0, 4  ;;  %s238_s12 = smov [#allocation3]   ;;  %s21_s11 = int_to_ptr.hbm [resolvable:$true] %s20_s11 }
   0x3   :  { %s22_s13 = sshll.u32 %s238_s12, 4  ;;  %s39_s16 = sshll.u32 %s268_s1, 4  ;;  %s23_s13 = int_to_ptr.vmem [resolvable:$true] %s22_s13  ;;  %s40_s16 = int_to_ptr.hbm [resolvable:$true] %s39_s16 }
   0x4   :  { %s239_s17 = smov 128   ;;  %s240_s18 = smov 8  }
   0x5   :  { %28 = dma.hbm_to_vmem [thread:$0]  %s21_s11, 256, %s23_s13, [#allocation4], %s239_s17, %s239_s17, %s240_s18  }
   0x6   :  { %s241_s19 = smov [#allocation6]  }
   0x7   :  { %s41_s20 = sshll.u32 %s241_s19, 4  ;;  %s42_s20 = int_to_ptr.vmem [resolvable:$true] %s41_s20 }
   0x8   :  { %47 = dma.hbm_to_vmem [thread:$0]  %s40_s16, 256, %s42_s20, [#allocation7], %s239_s17, %s239_s17, %s240_s18  }
   0x9   :  { %232 = dma.done.wait [#allocation4], 256  }
   0xa   :  { %233 = vsyncadd [#allocation4], 4294967040 }
   0xb   :  { %234 = dma.done.wait [#allocation7], 256  }
   0xc   :  { %235 = vsyncadd [#allocation7], 4294967040  ;;  %v70_v0 = vld [vmem:[#allocation3] sm:$0xff]  ;;  %v71_v1 = vld [vmem:[#allocation3 + $0x8] sm:$0xff]  ;;  %s242_s0 = smov [#allocation8]   ;;  %s138_s23 = sshll.u32 %s269_s2, 4  ;;  %s139_s23 = int_to_ptr.hbm [resolvable:$true] %s138_s23 }
   0xd   :  { %v72_v2 = vld [vmem:[#allocation6] sm:$0xff]  ;;  %v73_v3 = vld [vmem:[#allocation6 + $0x8] sm:$0xff]  ;;  %s136_s1 = sshll.u32 %s242_s0, 4  ;;  %vm129_vm0 = vcmask 0   ;;  %s137_s1 = int_to_ptr.vmem [resolvable:$true] %s136_s1 }
   0xe   :  { %v74_v4 = vsub.f32 %v70_v0, %v72_v2  ;;  %v75_v5 = vsub.f32 %v71_v1, %v73_v3 }
  0x10   :  { %v85_v6 = vmul.f32 %v74_v4, %v74_v4  ;;  %v86_v7 = vmul.f32 %v75_v5, %v75_v5 }
  0x12   :  { %v118_v8 = vadd.f32 %v86_v7, %v85_v6 }
  0x14   :  { %119 = vadd.xlane.f32.xlu0 %v118_v8 }
  0x87   :  { %v120_v9 = vpop.xlane.xlu0 %119 }
  0x88   :  { %v121_v10 = vrot.slane %v120_v9, 4 }
  0x8a   :  { %v122_v11 = vadd.f32 %v121_v10, %v120_v9 }
  0x8c   :  { %v123_v12 = vrot.slane %v122_v11, 2 }
  0x8e   :  { %v124_v13 = vadd.f32 %v123_v12, %v122_v11 }
  0x90   :  { %v125_v14 = vrot.slane %v124_v13, 1 }
  0x92   :  { %v126_v15 = vadd.f32 %v125_v14, %v124_v13 }
  0x94   :  { %153 = vpush %v126_v15 }
  0xc5   :  { %s154_s24 = spop %153 }
  0xc6   :  { %v128_v16 = vstv %s154_s24 }
  0xc7   :  { %130 = vst.msk [vmem:[#allocation8] sm:$0x1] %vm129_vm0, %v128_v16 }
  0xc8   :  { %141 = dma.vmem_to_hbm [thread:$0]  %s137_s1, 16, %s139_s23, [#allocation5]  }
  0xc9   :  { %236 = dma.done.wait [#allocation5], 16  }
  0xca   :  { %237 = vsyncadd [#allocation5], 4294967280 }
  0xcb   :  { %146 = vsyncpa [#allocation4], 1 }
  0xcc   :  { %147 = vsyncpa [#allocation7], 1 }
  0xcd   :  { %148 = vsyncpa [#allocation5], 1 }

</bundles_post_ra>
